<compile_context>
chip_gen: v7x
topology: tpu7x:2x2x1
jax: 0.10.0
libtpu: 0.0.40
codegen_flags: <defaults>
</compile_context>

<pallas_src>
import functools

import jax
import jax.numpy as jnp
from jax.experimental import pallas as pl
from jax.experimental.pallas import tpu as pltpu

MID1, MID2, MID3 = 40, 30, 20
NEG_SLOPE = 0.01          # torch.nn.LeakyReLU default
OUT_LANES = 128           # lane-dense padded width for the last layer / output


def _round_up(x, m):
    return ((x + m - 1) // m) * m


def _leaky_relu(x):
    return jnp.where(x > 0, x, NEG_SLOPE * x)


def mlp_kernel(x_ref, w1_ref, w2_ref, w3_ref, w4_ref, b_ref, o_ref):
    # x tile streams per grid step (bf16); weights + bias slab are VMEM-resident
    # (constant index_maps). All accumulation / elementwise work is f32.
    x = x_ref[...]                    # (TILE_B, F)        bf16
    b = b_ref[...]                    # (4, OUT_LANES)     f32 packed bias slab

    h = jnp.dot(x, w1_ref[...], preferred_element_type=jnp.float32)
    h = _leaky_relu(h + b[0:1, :MID1])

    h = jnp.dot(h.astype(w2_ref.dtype), w2_ref[...],
                preferred_element_type=jnp.float32)
    h = _leaky_relu(h + b[1:2, :MID2])

    h = jnp.dot(h.astype(w3_ref.dtype), w3_ref[...],
                preferred_element_type=jnp.float32)
    h = _leaky_relu(h + b[2:3, :MID3])

    h = jnp.dot(h.astype(w4_ref.dtype), w4_ref[...],
                preferred_element_type=jnp.float32)
    # last layer (no activation); padded columns are exactly 0 (zero W/b cols)
    o_ref[...] = (h + b[3:4, :]).astype(o_ref.dtype)


@functools.partial(jax.jit, static_argnames=("class_count", "tile_b"))
def mlp_forward(x, params, class_count, tile_b=512):
    (w1, b1), (w2, b2), (w3, b3), (w4, b4) = params
    batch, feature_size = x.shape

    # ---- operand prep (once, under jit) ------------------------------------
    x_bf = x.astype(jnp.bfloat16)
    w1_bf = w1.astype(jnp.bfloat16)
    w2_bf = w2.astype(jnp.bfloat16)
    w3_bf = w3.astype(jnp.bfloat16)
    # pad last layer's out dim to 128 lanes -> lane-dense output stores
    w4_pad = jnp.zeros((MID3, OUT_LANES), jnp.float32).at[:, :class_count].set(w4)
    w4_bf = w4_pad.astype(jnp.bfloat16)
    # pack the 4 biases into a single (4, 128) f32 slab (1 DMA instead of 4)
    bias_slab = jnp.zeros((4, OUT_LANES), jnp.float32)
    bias_slab = bias_slab.at[0, :MID1].set(b1.reshape(-1))
    bias_slab = bias_slab.at[1, :MID2].set(b2.reshape(-1))
    bias_slab = bias_slab.at[2, :MID3].set(b3.reshape(-1))
    bias_slab = bias_slab.at[3, :class_count].set(b4.reshape(-1))

    # ---- batch tiling (pad the tail tile) ----------------------------------
    tb = _round_up(min(tile_b, _round_up(batch, 8)), 8)
    batch_pad = _round_up(batch, tb)
    if batch_pad != batch:
        x_bf = jnp.pad(x_bf, ((0, batch_pad - batch), (0, 0)))
    grid = (batch_pad // tb,)

    def const_spec(shape):
        return pl.BlockSpec(shape, lambda i: (0, 0))

    out = pl.pallas_call(
        mlp_kernel,
        out_shape=jax.ShapeDtypeStruct((batch_pad, OUT_LANES), jnp.float32),
        grid=grid,
        in_specs=[
            pl.BlockSpec((tb, feature_size), lambda i: (i, 0)),   # x (streamed)
            const_spec((feature_size, MID1)),                     # w1 (resident)
            const_spec((MID1, MID2)),                             # w2
            const_spec((MID2, MID3)),                             # w3
            const_spec((MID3, OUT_LANES)),                        # w4 (lane-padded)
            const_spec((4, OUT_LANES)),                           # packed biases
        ],
        out_specs=pl.BlockSpec((tb, OUT_LANES), lambda i: (i, 0)),
        compiler_params=pltpu.CompilerParams(
            dimension_semantics=("parallel",)),
    )(x_bf, w1_bf, w2_bf, w3_bf, w4_bf, bias_slab)

    return out[:batch, :class_count]


def init_params(key, feature_size, class_count):
    """Deterministic init mimicking torch.nn.Linear (uniform +/- 1/sqrt(fan_in)).

    Weights are stored as [in, out] (transpose of torch's [out, in]); biases 1-D.
    """
    dims = [feature_size, MID1, MID2, MID3, class_count]
    params = []
    for i in range(4):
        fan_in, fan_out = dims[i], dims[i + 1]
        key, kw, kb = jax.random.split(key, 3)
        bound = 1.0 / jnp.sqrt(fan_in)
        w = jax.random.uniform(kw, (fan_in, fan_out), jnp.float32, -bound, bound)
        b = jax.random.uniform(kb, (fan_out,), jnp.float32, -bound, bound)
        params.append((w, b))
    return params


def reference_forward_f32(x, params):
    out = x
    for i, (w, b) in enumerate(params):
        out = out @ w + b.reshape(1, -1)
        if i < 3:
            out = _leaky_relu(out)
    return out


def reference_forward_bf16(x, params):
    """Mirrors the kernel numerics: bf16 dot inputs, f32 accumulation/ewise."""
    def lin(h, w, b):
        return jnp.dot(h.astype(jnp.bfloat16), w.astype(jnp.bfloat16),
                       preferred_element_type=jnp.float32) + b.reshape(1, -1)
    (w1, b1), (w2, b2), (w3, b3), (w4, b4) = params
    h = _leaky_relu(lin(x, w1, b1))
    h = _leaky_relu(lin(h, w2, b2))
    h = _leaky_relu(lin(h, w3, b3))
    return lin(h, w4, b4)


if __name__ == "__main__":
    feature_size = 16
    class_count = 4
    batch = 8

    key = jax.random.PRNGKey(0)
    key, kx = jax.random.split(key)
    x = jax.random.normal(kx, (batch, feature_size), jnp.float32)
    params = init_params(key, feature_size, class_count)

    out = mlp_forward(x, params, class_count)
    jax.block_until_ready(out)
    assert out.shape == (batch, class_count)

    ref_bf16 = reference_forward_bf16(x, params)
    ref_f32 = reference_forward_f32(x, params)
    assert jnp.allclose(out, ref_bf16, atol=1e-3, rtol=1e-3), "mismatch vs bf16 reference"
    assert jnp.allclose(out, ref_f32, atol=5e-2, rtol=5e-2), "mismatch vs f32 reference"

    # Exercise the tail-padding path (batch not a multiple of the tile).
    key, kx2 = jax.random.split(key)
    x2 = jax.random.normal(kx2, (50, feature_size), jnp.float32)
    out2 = mlp_forward(x2, params, class_count)
    jax.block_until_ready(out2)
    assert out2.shape == (50, class_count)
    assert jnp.allclose(out2, reference_forward_bf16(x2, params),
                        atol=1e-3, rtol=1e-3), "mismatch vs reference (padded batch)"

    print("KERNEL_OK")
</pallas_src>

<mosaic_0001>
module attributes {stable_mosaic.version = 11 : i64} {
  func.func @mlp_kernel(%arg0: i32, %arg1: memref<8x16xbf16, #tpu.memory_space<vmem>>, %arg2: memref<16x40xbf16, #tpu.memory_space<vmem>>, %arg3: memref<40x30xbf16, #tpu.memory_space<vmem>>, %arg4: memref<30x20xbf16, #tpu.memory_space<vmem>>, %arg5: memref<20x128xbf16, #tpu.memory_space<vmem>>, %arg6: memref<4x128xf32, #tpu.memory_space<vmem>>, %arg7: memref<8x128xf32, #tpu.memory_space<vmem>>) attributes {dimension_semantics = [#tpu.dimension_semantics<parallel>], iteration_bounds = array<i64: 1>, scalar_prefetch = 0 : i64, scratch_operands = 0 : i64, tpu.core_type = #tpu.core_type<tc>, window_params = [{transform_indices = @transform_0, window_bounds = array<i64: 8, 16>}, {pipeline_mode = #tpu.pipeline_mode<synchronous>, transform_indices = @transform_1, window_bounds = array<i64: 16, 40>}, {pipeline_mode = #tpu.pipeline_mode<synchronous>, transform_indices = @transform_2, window_bounds = array<i64: 40, 30>}, {pipeline_mode = #tpu.pipeline_mode<synchronous>, transform_indices = @transform_3, window_bounds = array<i64: 30, 20>}, {pipeline_mode = #tpu.pipeline_mode<synchronous>, transform_indices = @transform_4, window_bounds = array<i64: 20, 128>}, {pipeline_mode = #tpu.pipeline_mode<synchronous>, transform_indices = @transform_5, window_bounds = array<i64: 4, 128>}, {transform_indices = @transform_6, window_bounds = array<i64: 8, 128>}]} {
    %c0 = arith.constant 0 : index
    %c0_0 = arith.constant 0 : index
    %0 = vector.load %arg1[%c0, %c0_0] : memref<8x16xbf16, #tpu.memory_space<vmem>>, vector<8x16xbf16>
    %c0_1 = arith.constant 0 : index
    %c0_2 = arith.constant 0 : index
    %1 = vector.load %arg6[%c0_1, %c0_2] : memref<4x128xf32, #tpu.memory_space<vmem>>, vector<4x128xf32>
    %c0_3 = arith.constant 0 : index
    %c0_4 = arith.constant 0 : index
    %2 = vector.load %arg2[%c0_3, %c0_4] : memref<16x40xbf16, #tpu.memory_space<vmem>>, vector<16x40xbf16>
    %cst = arith.constant dense<0.000000e+00> : vector<8x40xf32>
    %3 = tpu.matmul %0, %2, %cst {dimension_numbers = #tpu.dot_dimension_numbers<[1], [0], [0], [1], [0, 0, 1, 1], [], []>} : vector<8x16xbf16>, vector<16x40xbf16>, vector<8x40xf32> -> vector<8x40xf32>
    %4 = vector.extract_strided_slice %1 {offsets = [0, 0], sizes = [1, 40], strides = [1, 1]} : vector<4x128xf32> to vector<1x40xf32>
    %5 = vector.broadcast %4 : vector<1x40xf32> to vector<8x40xf32>
    %6 = arith.addf %3, %5 : vector<8x40xf32>
    %cst_5 = arith.constant 0.000000e+00 : f32
    %7 = vector.broadcast %cst_5 : f32 to vector<8x40xf32>
    %8 = arith.cmpf ogt, %6, %7 : vector<8x40xf32>
    %cst_6 = arith.constant 0.00999999977 : f32
    %9 = vector.broadcast %cst_6 : f32 to vector<8x40xf32>
    %10 = arith.mulf %9, %6 : vector<8x40xf32>
    %11 = arith.select %8, %6, %10 : vector<8x40xi1>, vector<8x40xf32>
    %12 = arith.truncf %11 : vector<8x40xf32> to vector<8x40xbf16>
    %c0_7 = arith.constant 0 : index
    %c0_8 = arith.constant 0 : index
    %13 = vector.load %arg3[%c0_7, %c0_8] : memref<40x30xbf16, #tpu.memory_space<vmem>>, vector<40x30xbf16>
    %cst_9 = arith.constant dense<0.000000e+00> : vector<8x30xf32>
    %14 = tpu.matmul %12, %13, %cst_9 {dimension_numbers = #tpu.dot_dimension_numbers<[1], [0], [0], [1], [0, 0, 1, 1], [], []>} : vector<8x40xbf16>, vector<40x30xbf16>, vector<8x30xf32> -> vector<8x30xf32>
    %15 = vector.extract_strided_slice %1 {offsets = [1, 0], sizes = [1, 30], strides = [1, 1]} : vector<4x128xf32> to vector<1x30xf32>
    %16 = vector.broadcast %15 : vector<1x30xf32> to vector<8x30xf32>
    %17 = arith.addf %14, %16 : vector<8x30xf32>
    %cst_10 = arith.constant 0.000000e+00 : f32
    %18 = vector.broadcast %cst_10 : f32 to vector<8x30xf32>
    %19 = arith.cmpf ogt, %17, %18 : vector<8x30xf32>
    %cst_11 = arith.constant 0.00999999977 : f32
    %20 = vector.broadcast %cst_11 : f32 to vector<8x30xf32>
    %21 = arith.mulf %20, %17 : vector<8x30xf32>
    %22 = arith.select %19, %17, %21 : vector<8x30xi1>, vector<8x30xf32>
    %23 = arith.truncf %22 : vector<8x30xf32> to vector<8x30xbf16>
    %c0_12 = arith.constant 0 : index
    %c0_13 = arith.constant 0 : index
    %24 = vector.load %arg4[%c0_12, %c0_13] : memref<30x20xbf16, #tpu.memory_space<vmem>>, vector<30x20xbf16>
    %cst_14 = arith.constant dense<0.000000e+00> : vector<8x20xf32>
    %25 = tpu.matmul %23, %24, %cst_14 {dimension_numbers = #tpu.dot_dimension_numbers<[1], [0], [0], [1], [0, 0, 1, 1], [], []>} : vector<8x30xbf16>, vector<30x20xbf16>, vector<8x20xf32> -> vector<8x20xf32>
    %26 = vector.extract_strided_slice %1 {offsets = [2, 0], sizes = [1, 20], strides = [1, 1]} : vector<4x128xf32> to vector<1x20xf32>
    %27 = vector.broadcast %26 : vector<1x20xf32> to vector<8x20xf32>
    %28 = arith.addf %25, %27 : vector<8x20xf32>
    %cst_15 = arith.constant 0.000000e+00 : f32
    %29 = vector.broadcast %cst_15 : f32 to vector<8x20xf32>
    %30 = arith.cmpf ogt, %28, %29 : vector<8x20xf32>
    %cst_16 = arith.constant 0.00999999977 : f32
    %31 = vector.broadcast %cst_16 : f32 to vector<8x20xf32>
    %32 = arith.mulf %31, %28 : vector<8x20xf32>
    %33 = arith.select %30, %28, %32 : vector<8x20xi1>, vector<8x20xf32>
    %34 = arith.truncf %33 : vector<8x20xf32> to vector<8x20xbf16>
    %c0_17 = arith.constant 0 : index
    %c0_18 = arith.constant 0 : index
    %35 = vector.load %arg5[%c0_17, %c0_18] : memref<20x128xbf16, #tpu.memory_space<vmem>>, vector<20x128xbf16>
    %cst_19 = arith.constant dense<0.000000e+00> : vector<8x128xf32>
    %36 = tpu.matmul %34, %35, %cst_19 {dimension_numbers = #tpu.dot_dimension_numbers<[1], [0], [0], [1], [0, 0, 1, 1], [], []>} : vector<8x20xbf16>, vector<20x128xbf16>, vector<8x128xf32> -> vector<8x128xf32>
    %37 = vector.extract_strided_slice %1 {offsets = [3, 0], sizes = [1, 128], strides = [1, 1]} : vector<4x128xf32> to vector<1x128xf32>
    %38 = vector.broadcast %37 : vector<1x128xf32> to vector<8x128xf32>
    %39 = arith.addf %36, %38 : vector<8x128xf32>
    %c0_20 = arith.constant 0 : index
    %c0_21 = arith.constant 0 : index
    %40 = vector.load %arg7[%c0_20, %c0_21] : memref<8x128xf32, #tpu.memory_space<vmem>>, vector<8x128xf32>
    tpu.vector_store %arg7[%c0_20, %c0_21], %39 {strides = array<i32>} : memref<8x128xf32, #tpu.memory_space<vmem>>, vector<8x128xf32>,
    return
  }
  func.func @transform_0(%arg0: i32) -> (i32, i32) {
    %c0_i32 = arith.constant 0 : i32
    %c0_i32_0 = arith.constant 0 : i32
    return %arg0, %c0_i32 : i32, i32
  }
  func.func @transform_1(%arg0: i32) -> (i32, i32) {
    %c0_i32 = arith.constant 0 : i32
    %c0_i32_0 = arith.constant 0 : i32
    %c0_i32_1 = arith.constant 0 : i32
    return %c0_i32, %c0_i32_0 : i32, i32
  }
  func.func @transform_2(%arg0: i32) -> (i32, i32) {
    %c0_i32 = arith.constant 0 : i32
    %c0_i32_0 = arith.constant 0 : i32
    %c0_i32_1 = arith.constant 0 : i32
    return %c0_i32, %c0_i32_0 : i32, i32
  }
  func.func @transform_3(%arg0: i32) -> (i32, i32) {
    %c0_i32 = arith.constant 0 : i32
    %c0_i32_0 = arith.constant 0 : i32
    %c0_i32_1 = arith.constant 0 : i32
    return %c0_i32, %c0_i32_0 : i32, i32
  }
  func.func @transform_4(%arg0: i32) -> (i32, i32) {
    %c0_i32 = arith.constant 0 : i32
    %c0_i32_0 = arith.constant 0 : i32
    %c0_i32_1 = arith.constant 0 : i32
    return %c0_i32, %c0_i32_0 : i32, i32
  }
  func.func @transform_5(%arg0: i32) -> (i32, i32) {
    %c0_i32 = arith.constant 0 : i32
    %c0_i32_0 = arith.constant 0 : i32
    %c0_i32_1 = arith.constant 0 : i32
    return %c0_i32, %c0_i32_0 : i32, i32
  }
  func.func @transform_6(%arg0: i32) -> (i32, i32) {
    %c0_i32 = arith.constant 0 : i32
    %c0_i32_0 = arith.constant 0 : i32
    return %arg0, %c0_i32 : i32, i32
  }
}

</mosaic_0001>

<bundles_post_ra>
// kernel: mlp_forward.1
= control target key start
LH: loop header
LB: loop body
LE: loop exit
PB: predicated region body
PF: predicated region fallthrough
CT: control target
= control target key end

     0   :  { %v368_v0 = vmov 0.0   ;;  %vm369_vm0 = vmmov 0   ;;  %vm38_vm1 = vcmask 130048   ;;  %vm114_vm2 = vcmask 1043456   ;;  %s454_s1 = inlined_call_operand.vmem [shape: bf16[16,40], index: 1, kind: input, shape index: {}]   ;;  %s455_s0 = inlined_call_operand.vmem [shape: bf16[8,16], index: 0, kind: input, shape index: {}]   ;;  %s456_s2 = inlined_call_operand.vmem [shape: bf16[40,30], index: 2, kind: input, shape index: {}]   ;;  %s457_s5 = inlined_call_operand.vmem [shape: f32[4,128], index: 5, kind: input, shape index: {}]   ;;  %s458_s3 = inlined_call_operand.vmem [shape: bf16[30,20], index: 3, kind: input, shape index: {}]   ;;  %s459_s4 = inlined_call_operand.vmem [shape: bf16[20,128], index: 4, kind: input, shape index: {}]   ;;  %s460_s6 = inlined_call_operand.vmem [shape: f32[8,128], index: 6, kind: output, shape index: {}]  }
   0x1   :  { %326 = vmatprep.subr.bf16.mxu1 %v368_v0  ;;  %v360_v1 = vld [vmem:[%s454_s1] sm:$0xff]   ;;  %328 = vmatprep.mubr.msk.bf16.mxu1 %vm369_vm0, %v368_v0  ;;  %v362_v4 = vld [vmem:[%s456_s2 + $0x8] sm:$0xff]   ;;  %v363_v5 = vld [vmem:[%s456_s2 + $0x10] ss:$0 sps:$4 sm:$0xff]   ;;  %v28_v7 = vlaneseq  ;;  %vm110_vm4 = vcmask 326656   ;;  %vm185_vm5 = vcmask 1046528  }
   0x2   :  { %342 = vmatprep.subr.bf16.mxu0 %v368_v0  ;;  %346 = vmatprep.mubr.msk.bf16.mxu0 %vm369_vm0, %v368_v0  ;;  %v24_v2 = vld [vmem:[%s455_s0] sm:$0xf]  ;;  %v116_v6 = vsel %vm114_vm2, %v363_v5, 0  ;;  %v365_v21 = vld [vmem:[%s458_s3 + $0x8] sm:$0x7f]   ;;  %vm181_vm7 = vcmask 244736  }
   0x3   :  { %327 = vmatpush3.bf16.msra.mxu1 %v360_v1  ;;  %v361_v3 = vld [vmem:[%s456_s2] sm:$0xff]   ;;  %v29_v8 = vshrl.u32 %v28_v7, 7  ;;  %v187_v22 = vsel %vm185_vm5, %v365_v21, 0  ;;  %v367_v34 = vld [vmem:[%s459_s4 + $0x8] ss:$0 sps:$4 sm:$0x33]  }
   0x4   :  { %332 = vmatprep.subr.bf16.mxu1 %v368_v0  ;;  %v25_v10 = vld [vmem:[%s457_s5] sm:$0xf]  ;;  %vm253_vm8 = vcmask 1041408   ;;  %vm249_vm10 = vcmask 162816  }
   0x5   :  { %v30_v9 = vsub.s32 0, %v29_v8  ;;  %v364_v20 = vld [vmem:[%s458_s3] sm:$0xff]   ;;  %v93_v23 = vsub.s32 1, %v29_v8  ;;  %v255_v35 = vsel %vm253_vm8, %v367_v34, 0  ;;  %v168_v36 = vsub.s32 2, %v29_v8 }
   0x6   :  { %329 = vmatmul.mubr.msk.bf16.vlgmr.msra.gmra.mrb[0].mxu1 %vm38_vm1, %v24_v2  ;;  %343 = vmatpush3.bf16.msra.mxu0 %v364_v20  ;;  %v366_v33 = vld [vmem:[%s459_s4] sm:$0xff]   ;;  %v238_v46 = vsub.s32 3, %v29_v8 }
   0x7   :  { %333 = vmatpush3.bf16.msra.mxu1 %v361_v3  ;;  %338 = vmatprep.mubr.msk.bf16.mxu1 %vm369_vm0, %v368_v0  ;;  %v31_v11 = vrot.slane %v25_v10, %v30_v9  ;;  %v94_v24 = vrot.slane %v25_v10, %v93_v23  ;;  %v169_v37 = vrot.slane %v25_v10, %v168_v36 }
   0x8   :  { %334 = vmatprep.subr.bf16.mxu1 %v368_v0  ;;  %344 = vmatprep.subr.bf16.mxu0 %v368_v0  ;;  %v239_v47 = vrot.slane %v25_v10, %v238_v46 }
   0xa   :  { %345 = vmatpush3.bf16.msra.mxu0 %v187_v22 }
   0xb   :  { %335 = vmatpush3.bf16.msra.mxu1 %v362_v4  ;;  %350 = vmatprep.subr.bf16.mxu0 %v368_v0 }
   0xc   :  { %336 = vmatprep.subr.bf16.mxu1 %v368_v0 }
   0xf   :  { %337 = vmatpush3.bf16.msra.mxu1 %v116_v6 }
  0xd9   :  { %v76_v12 = vpop.f32.mrb[0].mxu1 }
  0xda   :  { %v77_v13 = vadd.f32 %v76_v12, %v31_v11  ;;  %v330_v14 = vpop.f32.mrb[1].mxu1 }
  0xdb   :  { %v79_v15 = vpop.f32.mrb[2].mxu1 }
  0xdc   :  { %vm82_vm3 = vcmp.gt.f32.partialorder %v77_v13, 0.0  ;;  %v83_v16 = vmul.f32 0.01, %v77_v13  ;;  %v331_v17 = vpop.f32.mrb[3].mxu1 }
  0xde   :  { %v84_v18 = vsel %vm82_vm3, %v77_v13, %v83_v16 }
  0xdf   :  { %v85_v19 = vpack.c.bf16 %v84_v18, %v84_v18 }
  0xe1   :  { %339 = vmatmul.mubr.msk.bf16.vlgmr.msra.gmra.mrb[4].mxu1 %vm110_vm4, %v85_v19 }
 0x1b4   :  { %v152_v25 = vpop.f32.mrb[4].mxu1 }
 0x1b5   :  { %v153_v26 = vadd.f32 %v152_v25, %v94_v24  ;;  %v340_v27 = vpop.f32.mrb[5].mxu1 }
 0x1b6   :  { %v155_v28 = vpop.f32.mrb[6].mxu1 }
 0x1b7   :  { %vm158_vm6 = vcmp.gt.f32.partialorder %v153_v26, 0.0  ;;  %v159_v29 = vmul.f32 0.01, %v153_v26  ;;  %v341_v30 = vpop.f32.mrb[7].mxu1 }
 0x1b9   :  { %v160_v31 = vsel %vm158_vm6, %v153_v26, %v159_v29 }
 0x1ba   :  { %v161_v32 = vpack.c.bf16 %v160_v31, %v160_v31 }
 0x1bc   :  { %347 = vmatmul.mubr.msk.bf16.vlgmr.msra.gmra.mrb[0].mxu0 %vm181_vm7, %v161_v32 }
 0x1bd   :  { %354 = vmatprep.mubr.msk.bf16.mxu0 %vm369_vm0, %v368_v0  ;;  %351 = vmatpush3.bf16.msra.mxu0 %v366_v33 }
 0x1be   :  { %352 = vmatprep.subr.bf16.mxu0 %v368_v0 }
 0x1c1   :  { %353 = vmatpush3.bf16.msra.mxu0 %v255_v35 }
 0x28f   :  { %v223_v38 = vpop.f32.mrb[0].mxu0 }
 0x290   :  { %v224_v39 = vadd.f32 %v223_v38, %v169_v37  ;;  %v348_v40 = vpop.f32.mrb[1].mxu0 }
 0x291   :  { %v226_v41 = vpop.f32.mrb[2].mxu0 }
 0x292   :  { %vm229_vm9 = vcmp.gt.f32.partialorder %v224_v39, 0.0  ;;  %v230_v42 = vmul.f32 0.01, %v224_v39  ;;  %v349_v43 = vpop.f32.mrb[3].mxu0 }
 0x294   :  { %v231_v44 = vsel %vm229_vm9, %v224_v39, %v230_v42 }
 0x295   :  { %v232_v45 = vpack.c.bf16 %v231_v44, %v231_v44 }
 0x297   :  { %355 = vmatmul.mubr.msk.bf16.vlgmr.msra.gmra.mrb[4].mxu0 %vm249_vm10, %v232_v45 }
 0x36a   :  { %v291_v48 = vpop.f32.mrb[4].mxu0 }
 0x36b   :  { %v292_v49 = vadd.f32 %v291_v48, %v239_v47  ;;  %v356_v50 = vpop.f32.mrb[5].mxu0 }
 0x36c   :  { %v294_v51 = vpop.f32.mrb[6].mxu0 }
 0x36d   :  { %297 = vst [vmem:[%s460_s6] sm:$0xff] %v292_v49  ;;  %v357_v52 = vpop.f32.mrb[7].mxu0 }

</bundles_post_ra>
